<compile_context>
chip_gen: v7x
topology: tpu7x:2x2x1
jax: 0.10.0
libtpu: 0.0.40
codegen_flags: <defaults>
</compile_context>

<pallas_src>
import jax
import jax.numpy as jnp
import numpy as np
from jax.experimental import pallas as pl
from jax.experimental.pallas import tpu as pltpu

LANE = 128


def _cdiv(a, b):
    return (a + b - 1) // b


def _round_up(v, m):
    return _cdiv(v, m) * m


def _pad_to(arr, shape):
    return jnp.pad(arr, [(0, t - s) for s, t in zip(arr.shape, shape)])


# ----------------------------- Pallas kernels --------------------------------
def precompute_kernel(x_ref, wl_ref, wr_ref, b_ref, y_ref, z0_ref):
    # x_ref : [TPRE, Fp] bf16   node features (row tile)
    # wl_ref: [Fp, Hp]   bf16   neighbor weight
    # wr_ref: [Fp, Hp]   bf16   root/self weight
    # b_ref : [1, Hp]    f32    bias
    # y_ref : [TPRE, Hp] bf16   X @ Wl   (neighbor-message term, bf16 for MXU)
    # z0_ref: [TPRE, Hp] f32    X @ Wr + b (root/self term)
    x = x_ref[...]
    y_ref[...] = jnp.dot(x, wl_ref[...],
                         preferred_element_type=jnp.float32).astype(jnp.bfloat16)
    z0_ref[...] = jnp.dot(x, wr_ref[...],
                          preferred_element_type=jnp.float32) + b_ref[...]


def sage_agg_relu_kernel(a_ref, y_ref, z0_ref, o_ref):
    # a_ref : [TM, TK]  bf16  row-normalized adjacency tile (mean aggregation)
    # y_ref : [TK, Hp]  bf16  precomputed X @ Wl (reduction side)
    # z0_ref: [TM, Hp]  f32   precomputed X @ Wr + b (self term)
    # o_ref : [TM, Hp]  f32   output tile; resident across k => f32 accumulator
    k = pl.program_id(1)

    @pl.when(k == 0)
    def _():
        o_ref[...] = z0_ref[...]

    o_ref[...] += jnp.dot(a_ref[...], y_ref[...],
                          preferred_element_type=jnp.float32)

    @pl.when(k == pl.num_programs(1) - 1)
    def _():
        o_ref[...] = jnp.maximum(o_ref[...], 0.0)     # fused ReLU epilogue


# ------------------------------ wrapper ---------------------------------------
def sage_conv_relu(a, x, wl, wr, b):
    """relu(SAGEConv(x)) = relu(A @ (X@Wl) + X@Wr + b) as two Pallas calls."""
    N, F = x.shape
    H = wl.shape[1]
    Fp = _round_up(F, LANE)
    Hp = _round_up(H, LANE)

    # --- tile geometry --------------------------------------------------------
    # K is A's lane dim -> multiples of 128; rows only need sublane granularity
    # (16 for bf16).  Always >= 2 row tiles so the "parallel" axis can feed both
    # v7x TensorCores.  1024 tiles: 2 MiB bf16 A block, 4 MiB double-buffered.
    TK = min(1024, _round_up(N, LANE))
    Nk = _round_up(N, TK)
    TM = min(1024, max(16, _round_up(_cdiv(N, 2), 16)))
    Nr = max(_round_up(N, TM), 2 * TM)

    # --- pre-pass: Y = bf16(X @ Wl), Z0 = X @ Wr + b --------------------------
    Nbig = max(Nr, Nk)
    TPRE = 512 if Nbig >= 512 else Nbig
    Npre = _round_up(Nbig, TPRE)

    x_p = _pad_to(x, (Npre, Fp)).astype(jnp.bfloat16)
    wl_p = _pad_to(wl, (Fp, Hp)).astype(jnp.bfloat16)
    wr_p = _pad_to(wr, (Fp, Hp)).astype(jnp.bfloat16)
    b_p = _pad_to(b, (1, Hp)).astype(jnp.float32)

    y_full, z0_full = pl.pallas_call(
        precompute_kernel,
        out_shape=(jax.ShapeDtypeStruct((Npre, Hp), jnp.bfloat16),
                   jax.ShapeDtypeStruct((Npre, Hp), jnp.float32)),
        grid_spec=pltpu.PrefetchScalarGridSpec(
            num_scalar_prefetch=0,
            grid=(Npre // TPRE,),
            in_specs=[
                pl.BlockSpec((TPRE, Fp), lambda i: (i, 0)),   # X row tile
                pl.BlockSpec((Fp, Hp), lambda i: (0, 0)),     # Wl
                pl.BlockSpec((Fp, Hp), lambda i: (0, 0)),     # Wr
                pl.BlockSpec((1, Hp), lambda i: (0, 0)),      # bias
            ],
            out_specs=[
                pl.BlockSpec((TPRE, Hp), lambda i: (i, 0)),   # Y
                pl.BlockSpec((TPRE, Hp), lambda i: (i, 0)),   # Z0
            ],
        ),
        compiler_params=pltpu.CompilerParams(
            dimension_semantics=("parallel",)),
    )(x_p, wl_p, wr_p, b_p)

    y_p = y_full[:Nk]      # padded rows of Y multiply A's zero columns -> safe
    z0_p = z0_full[:Nr]    # padded rows of output are sliced off below

    # --- main pass: O = relu(A @ Y + Z0), accumulated in output space ---------
    a_p = _pad_to(a, (Nr, Nk)).astype(jnp.bfloat16)

    out = pl.pallas_call(
        sage_agg_relu_kernel,
        out_shape=jax.ShapeDtypeStruct((Nr, Hp), jnp.float32),
        grid_spec=pltpu.PrefetchScalarGridSpec(
            num_scalar_prefetch=0,
            grid=(Nr // TM, Nk // TK),          # rows "parallel", K reduction last
            in_specs=[
                pl.BlockSpec((TM, TK), lambda i, k: (i, k)),   # A tile
                pl.BlockSpec((TK, Hp), lambda i, k: (k, 0)),   # Y (reduction side)
                pl.BlockSpec((TM, Hp), lambda i, k: (i, 0)),   # Z0 (self term)
            ],
            out_specs=pl.BlockSpec((TM, Hp), lambda i, k: (i, 0)),
        ),
        compiler_params=pltpu.CompilerParams(
            dimension_semantics=("parallel", "arbitrary")),
    )(a_p, y_p, z0_p)
    return out[:N, :H]


# ------------------------------ JAX glue --------------------------------------
def build_mean_adj(edge_index, num_nodes):
    """Dense mean-aggregation operator A: A[i, j] = 1/indeg(i) if edge j->i."""
    # TODO(synk): replace with CSR gather aggregation for production graph sizes.
    src, dst = edge_index[0], edge_index[1]
    a = jnp.zeros((num_nodes, num_nodes), jnp.float32)
    a = a.at[dst, src].add(1.0)
    deg = jnp.sum(a, axis=1, keepdims=True)
    return a / jnp.maximum(deg, 1.0)      # nodes w/o in-edges -> zero aggregation


def init_params(key, in_feats, n_hidden):
    k1, k2, k3 = jax.random.split(key, 3)
    scale = 1.0 / np.sqrt(in_feats)
    wl = jax.random.uniform(k1, (in_feats, n_hidden), jnp.float32, -scale, scale)
    wr = jax.random.uniform(k2, (in_feats, n_hidden), jnp.float32, -scale, scale)
    b = jax.random.uniform(k3, (1, n_hidden), jnp.float32, -scale, scale)
    return {"wl": wl, "wr": wr, "b": b}


def res_gcn_forward(x, edge_index, params):
    """Matches Res_GCN.forward with gnn_method=['sage'] in eval mode."""
    num_nodes = x.shape[0]
    a = build_mean_adj(edge_index, num_nodes)
    mid_node_feats = []                                  # range(num_layers-2) empty
    fea = sage_conv_relu(a, x, params["wl"], params["wr"], params["b"])
    # F.dropout(p=0.2, training=False) is the identity at inference time.
    return fea, mid_node_feats


# Pure-JAX reference matching the kernel's bf16-input / f32-accumulate numerics.
def reference_forward(x, edge_index, params):
    a = build_mean_adj(edge_index, x.shape[0]).astype(jnp.bfloat16)
    xb = x.astype(jnp.bfloat16)
    wl = params["wl"].astype(jnp.bfloat16)
    wr = params["wr"].astype(jnp.bfloat16)
    y = jnp.dot(xb, wl, preferred_element_type=jnp.float32).astype(jnp.bfloat16)
    z0 = jnp.dot(xb, wr, preferred_element_type=jnp.float32) + params["b"]
    h = jnp.dot(a, y, preferred_element_type=jnp.float32) + z0
    return jnp.maximum(h, 0.0)


if __name__ == "__main__":
    key = jax.random.PRNGKey(0)
    k_x, k_src, k_dst, k_p = jax.random.split(key, 4)

    N, IN_FEATS, N_HIDDEN, E = 16, 16, 32, 48

    x = jax.random.normal(k_x, (N, IN_FEATS), jnp.float32)
    edge_index = jnp.stack([
        jax.random.randint(k_src, (E,), 0, N, jnp.int32),
        jax.random.randint(k_dst, (E,), 0, N, jnp.int32),
    ], axis=0)

    params = init_params(k_p, IN_FEATS, N_HIDDEN)

    fea, mids = res_gcn_forward(x, edge_index, params)
    fea = jax.block_until_ready(fea)

    ref = np.asarray(reference_forward(x, edge_index, params))
    np.testing.assert_allclose(np.asarray(fea), ref, rtol=1e-3, atol=1e-3)
    assert mids == []
    assert fea.shape == (N, N_HIDDEN)

    print("KERNEL_OK")
</pallas_src>

<mosaic_0001>
module attributes {stable_mosaic.version = 11 : i64} {
  func.func @precompute_kernel(%arg0: i32, %arg1: memref<128x128xbf16, #tpu.memory_space<vmem>>, %arg2: memref<128x128xbf16, #tpu.memory_space<vmem>>, %arg3: memref<128x128xbf16, #tpu.memory_space<vmem>>, %arg4: memref<1x128xf32, #tpu.memory_space<vmem>>, %arg5: memref<128x128xbf16, #tpu.memory_space<vmem>>, %arg6: memref<128x128xf32, #tpu.memory_space<vmem>>) attributes {dimension_semantics = [#tpu.dimension_semantics<parallel>], iteration_bounds = array<i64: 1>, scalar_prefetch = 0 : i64, scratch_operands = 0 : i64, tpu.core_type = #tpu.core_type<tc>, window_params = [{transform_indices = @transform_0, window_bounds = array<i64: 128, 128>}, {pipeline_mode = #tpu.pipeline_mode<synchronous>, transform_indices = @transform_1, window_bounds = array<i64: 128, 128>}, {pipeline_mode = #tpu.pipeline_mode<synchronous>, transform_indices = @transform_2, window_bounds = array<i64: 128, 128>}, {pipeline_mode = #tpu.pipeline_mode<synchronous>, transform_indices = @transform_3, window_bounds = array<i64: 1, 128>}, {transform_indices = @transform_4, window_bounds = array<i64: 128, 128>}, {transform_indices = @transform_5, window_bounds = array<i64: 128, 128>}]} {
    %c0 = arith.constant 0 : index
    %c0_0 = arith.constant 0 : index
    %0 = vector.load %arg1[%c0, %c0_0] : memref<128x128xbf16, #tpu.memory_space<vmem>>, vector<128x128xbf16>
    %c0_1 = arith.constant 0 : index
    %c0_2 = arith.constant 0 : index
    %1 = vector.load %arg2[%c0_1, %c0_2] : memref<128x128xbf16, #tpu.memory_space<vmem>>, vector<128x128xbf16>
    %cst = arith.constant dense<0.000000e+00> : vector<128x128xf32>
    %2 = tpu.matmul %0, %1, %cst {dimension_numbers = #tpu.dot_dimension_numbers<[1], [0], [0], [1], [0, 0, 1, 1], [], []>} : vector<128x128xbf16>, vector<128x128xbf16>, vector<128x128xf32> -> vector<128x128xf32>
    %3 = arith.truncf %2 : vector<128x128xf32> to vector<128x128xbf16>
    %c0_3 = arith.constant 0 : index
    %c0_4 = arith.constant 0 : index
    %4 = vector.load %arg5[%c0_3, %c0_4] : memref<128x128xbf16, #tpu.memory_space<vmem>>, vector<128x128xbf16>
    tpu.vector_store %arg5[%c0_3, %c0_4], %3 {strides = array<i32>} : memref<128x128xbf16, #tpu.memory_space<vmem>>, vector<128x128xbf16>,
    %c0_5 = arith.constant 0 : index
    %c0_6 = arith.constant 0 : index
    %5 = vector.load %arg3[%c0_5, %c0_6] : memref<128x128xbf16, #tpu.memory_space<vmem>>, vector<128x128xbf16>
    %cst_7 = arith.constant dense<0.000000e+00> : vector<128x128xf32>
    %6 = tpu.matmul %0, %5, %cst_7 {dimension_numbers = #tpu.dot_dimension_numbers<[1], [0], [0], [1], [0, 0, 1, 1], [], []>} : vector<128x128xbf16>, vector<128x128xbf16>, vector<128x128xf32> -> vector<128x128xf32>
    %c0_8 = arith.constant 0 : index
    %c0_9 = arith.constant 0 : index
    %7 = vector.load %arg4[%c0_8, %c0_9] : memref<1x128xf32, #tpu.memory_space<vmem>>, vector<1x128xf32>
    %8 = vector.broadcast %7 : vector<1x128xf32> to vector<128x128xf32>
    %9 = arith.addf %6, %8 : vector<128x128xf32>
    %c0_10 = arith.constant 0 : index
    %c0_11 = arith.constant 0 : index
    %10 = vector.load %arg6[%c0_10, %c0_11] : memref<128x128xf32, #tpu.memory_space<vmem>>, vector<128x128xf32>
    tpu.vector_store %arg6[%c0_10, %c0_11], %9 {strides = array<i32>} : memref<128x128xf32, #tpu.memory_space<vmem>>, vector<128x128xf32>,
    return
  }
  func.func @transform_0(%arg0: i32) -> (i32, i32) {
    %c0_i32 = arith.constant 0 : i32
    %c0_i32_0 = arith.constant 0 : i32
    return %arg0, %c0_i32 : i32, i32
  }
  func.func @transform_1(%arg0: i32) -> (i32, i32) {
    %c0_i32 = arith.constant 0 : i32
    %c0_i32_0 = arith.constant 0 : i32
    %c0_i32_1 = arith.constant 0 : i32
    return %c0_i32, %c0_i32_0 : i32, i32
  }
  func.func @transform_2(%arg0: i32) -> (i32, i32) {
    %c0_i32 = arith.constant 0 : i32
    %c0_i32_0 = arith.constant 0 : i32
    %c0_i32_1 = arith.constant 0 : i32
    return %c0_i32, %c0_i32_0 : i32, i32
  }
  func.func @transform_3(%arg0: i32) -> (i32, i32) {
    %c0_i32 = arith.constant 0 : i32
    %c0_i32_0 = arith.constant 0 : i32
    %c0_i32_1 = arith.constant 0 : i32
    return %c0_i32, %c0_i32_0 : i32, i32
  }
  func.func @transform_4(%arg0: i32) -> (i32, i32) {
    %c0_i32 = arith.constant 0 : i32
    %c0_i32_0 = arith.constant 0 : i32
    return %arg0, %c0_i32 : i32, i32
  }
  func.func @transform_5(%arg0: i32) -> (i32, i32) {
    %c0_i32 = arith.constant 0 : i32
    %c0_i32_0 = arith.constant 0 : i32
    return %arg0, %c0_i32 : i32, i32
  }
}

</mosaic_0001>

<bundles_post_ra>
// kernel: tpu_custom_call.1
= control target key start
LH: loop header
LB: loop body
LE: loop exit
PB: predicated region body
PF: predicated region fallthrough
CT: control target
= control target key end

     0   :  { %11 = vsyncpa [#allocation3], 0  ;;  %s1083_s0 = inlined_call_operand.hbm [shape: bf16[128,128], index: 0, kind: input, shape index: {}]   ;;  %s1084_s1 = inlined_call_operand.hbm [shape: bf16[128,128], index: 1, kind: input, shape index: {}]   ;;  %s1085_s2 = inlined_call_operand.hbm [shape: bf16[128,128], index: 2, kind: input, shape index: {}]   ;;  %s1086_s3 = inlined_call_operand.vmem [shape: f32[1,128], index: 3, kind: input, shape index: {}]   ;;  %s1087_s4 = inlined_call_operand.hbm [shape: bf16[128,128], index: 4, kind: output, shape index: {0}]   ;;  %s1088_s5 = inlined_call_operand.hbm [shape: f32[128,128], index: 5, kind: output, shape index: {1}]  }
   0x1   :  { %12 = vsyncpa [#allocation6], 0 }
   0x2   :  { %13 = vsyncpa [#allocation4], 0 }
   0x3   :  { %14 = vsyncpa [#allocation10], 0  ;;  %s937_s18 = smov [#allocation5]   ;;  %s938_s20 = smov [#allocation2]  }
   0x4   :  { %s32_s19 = sshll.u32 %s937_s18, 4  ;;  %s20_s21 = sshll.u32 %s938_s20, 4  ;;  %s33_s19 = int_to_ptr.vmem [resolvable:$true] %s32_s19  ;;  %s976_s21 = int_to_ptr.vmem [resolvable:$true] %s20_s21 }
   0x5   :  { %s819_s24 = scalar_lea.hbm %s1084_s1, 1024 }
   0x6   :  { %p820_p0 = scmp.ne.s32.totalorder %s1084_s1, %s819_s24  ;;  %p823_p1 = scmp.lt.u32.totalorder %s819_s24, %s1084_s1 }
   0x8   :  { %p825_p2 = pnand %p823_p1, %p820_p0 }
   0xa   :  { %828 = shalt.err (!%p825_p2)
}
   0xb   :  { %s829_s29 = scalar_lea.vmem %s33_s19, 1024  ;;  %p834_p4 = scmp.lt.s32.totalorder %s33_s19, %s33_s19 }
   0xc   :  { %p830_p3 = scmp.ne.s32.totalorder %s33_s19, %s829_s29  ;;  %p835_p5 = scmp.lt.s32.totalorder %s829_s29, %s829_s29 }
   0xe   :  { %p836_p6 = por %p835_p5, %p834_p4 }
  0x10   :  { %p837_p7 = pnand %p836_p6, %p830_p3 }
  0x12   :  { %840 = shalt.err (!%p837_p7)
}
  0x13   :  { %s939_s30 = smov 64   ;;  %s940_s6 = smov 4  }
  0x14   :  { %38 = dma.hbm_to_vmem [thread:$0]  %s1084_s1, 1024, %s33_s19, [#allocation6], %s939_s30, %s939_s30, %s940_s6  }
  0x15   :  { %s841_s11 = scalar_lea.hbm %s1083_s0, 1024 }
  0x16   :  { %p842_p8 = scmp.ne.s32.totalorder %s1083_s0, %s841_s11  ;;  %p845_p9 = scmp.lt.u32.totalorder %s841_s11, %s1083_s0 }
  0x18   :  { %p847_p10 = pnand %p845_p9, %p842_p8 }
  0x1a   :  { %850 = shalt.err (!%p847_p10)
}
  0x1b   :  { %s851_s16 = scalar_lea.vmem %s976_s21, 1024  ;;  %p856_p12 = scmp.lt.s32.totalorder %s976_s21, %s976_s21 }
  0x1c   :  { %p852_p11 = scmp.ne.s32.totalorder %s976_s21, %s851_s16  ;;  %p857_p13 = scmp.lt.s32.totalorder %s851_s16, %s851_s16 }
  0x1e   :  { %p858_p0 = por %p857_p13, %p856_p12 }
  0x20   :  { %p859_p1 = pnand %p858_p0, %p852_p11 }
  0x22   :  { %862 = shalt.err (!%p859_p1)
}
  0x23   :  { %26 = dma.hbm_to_vmem [thread:$0]  %s1083_s0, 1024, %s976_s21, [#allocation3], %s939_s30, %s939_s30, %s940_s6  }
  0x24   :  { %s941_s18 = smov [#allocation7]   ;;  %s863_s23 = scalar_lea.hbm %s1085_s2, 1024 }
  0x25   :  { %s44_s19 = sshll.u32 %s941_s18, 4  ;;  %p864_p2 = scmp.ne.s32.totalorder %s1085_s2, %s863_s23  ;;  %s45_s19 = int_to_ptr.vmem [resolvable:$true] %s44_s19 }
  0x26   :  { %p867_p3 = scmp.lt.u32.totalorder %s863_s23, %s1085_s2 }
  0x28   :  { %p869_p4 = pnand %p867_p3, %p864_p2 }
  0x2a   :  { %872 = shalt.err (!%p869_p4)
}
  0x2b   :  { %s873_s28 = scalar_lea.vmem %s45_s19, 1024  ;;  %p878_p6 = scmp.lt.s32.totalorder %s45_s19, %s45_s19 }
  0x2c   :  { %p874_p5 = scmp.ne.s32.totalorder %s45_s19, %s873_s28  ;;  %p879_p7 = scmp.lt.s32.totalorder %s873_s28, %s873_s28 }
  0x2e   :  { %p880_p8 = por %p879_p7, %p878_p6 }
  0x30   :  { %p881_p9 = pnand %p880_p8, %p874_p5 }
  0x32   :  { %884 = shalt.err (!%p881_p9)
}
  0x33   :  { %50 = dma.hbm_to_vmem [thread:$0]  %s1085_s2, 1024, %s45_s19, [#allocation6], %s939_s30, %s939_s30, %s940_s6  }
  0x34   :  { %929 = dma.done.wait [#allocation3], 1024  }
  0x35   :  { %930 = vsyncadd [#allocation3], 4294966272 }
  0x36   :  { %931 = dma.done.wait [#allocation6], 2048  }
  0x37   :  { %932 = vsyncadd [#allocation6], 4294965248  ;;  %v795_v0 = vld [vmem:[#allocation5] sm:$0xff]   ;;  %v797_v2 = vld [vmem:[#allocation5 + $0x8] sm:$0xff]   ;;  %s943_s8 = smov [#allocation9]  }
  0x38   :  { %v796_v1 = vld [vmem:[#allocation7] sm:$0xff]   ;;  %722 = vmatprep.subr.bf16.mxu0 %v795_v0  ;;  %v798_v3 = vld [vmem:[#allocation7 + $0x8] sm:$0xff]   ;;  %v799_v4 = vld [vmem:[#allocation5 + $0x10] sm:$0xff]   ;;  %s569_s9 = sshll.u32 %s943_s8, 4  ;;  %s1048_s9 = int_to_ptr.vmem [resolvable:$true] %s569_s9 }
  0x39   :  { %754 = vmatprep.subr.bf16.mxu1 %v796_v1  ;;  %723 = vmatpush3.bf16.msra.mxu0 %v795_v0  ;;  %v800_v5 = vld [vmem:[#allocation7 + $0x10] sm:$0xff]   ;;  %v801_v6 = vld [vmem:[#allocation5 + $0x18] sm:$0xff]   ;;  %v803_v8 = vld [vmem:[#allocation5 + $0x20] sm:$0xff]  }
  0x3a   :  { %755 = vmatpush3.bf16.msra.mxu1 %v796_v1  ;;  %724 = vmatprep.subr.bf16.mxu0 %v797_v2  ;;  %v802_v7 = vld [vmem:[#allocation7 + $0x18] sm:$0xff]   ;;  %v804_v9 = vld [vmem:[#allocation7 + $0x20] sm:$0xff]   ;;  %v805_v10 = vld [vmem:[#allocation5 + $0x28] sm:$0xff]  }
  0x3b   :  { %756 = vmatprep.subr.bf16.mxu1 %v798_v3  ;;  %v811_v11 = vld [vmem:[#allocation2] sm:$0xff]   ;;  %v806_v12 = vld [vmem:[#allocation7 + $0x28] sm:$0xff]   ;;  %v807_v13 = vld [vmem:[#allocation5 + $0x30] sm:$0xff]  }
  0x3c   :  { %738 = vmatprep.mubr.bf16.mxu0 %v811_v11  ;;  %770 = vmatprep.mubr.bf16.mxu1 %v811_v11  ;;  %v808_v14 = vld [vmem:[#allocation7 + $0x30] sm:$0xff]   ;;  %v809_v15 = vld [vmem:[#allocation5 + $0x38] sm:$0xff]   ;;  %v812_v17 = vld [vmem:[#allocation2 + $0x8] sm:$0xff]  }
  0x3d   :  { %725 = vmatpush3.bf16.msra.mxu0 %v797_v2  ;;  %v810_v16 = vld [vmem:[#allocation7 + $0x38] sm:$0xff]   ;;  %v813_v18 = vld [vmem:[#allocation2 + $0x10] sm:$0xff]   ;;  %v815_v20 = vld [vmem:[#allocation2 + $0x20] sm:$0xff]  }
  0x3e   :  { %757 = vmatpush3.bf16.msra.mxu1 %v798_v3  ;;  %726 = vmatprep.subr.bf16.mxu0 %v799_v4  ;;  %v814_v19 = vld [vmem:[#allocation2 + $0x18] sm:$0xff]   ;;  %v816_v21 = vld [vmem:[#allocation2 + $0x28] sm:$0xff]   ;;  %v817_v22 = vld [vmem:[#allocation2 + $0x30] sm:$0xff]  }
  0x3f   :  { %758 = vmatprep.subr.bf16.mxu1 %v800_v5  ;;  %v818_v23 = vld [vmem:[#allocation2 + $0x38] sm:$0xff]   ;;  %v1031_v24 = vld [vmem:[%s1086_s3] ss:$0 sm:$0xff]  ;;  %s942_s3 = smov [#allocation8]  }
  0x40   :  { %s557_s7 = sshll.u32 %s942_s3, 4  ;;  %s558_s7 = int_to_ptr.vmem [resolvable:$true] %s557_s7 }
  0x41   :  { %727 = vmatpush3.bf16.msra.mxu0 %v799_v4  ;;  %s885_s10 = scalar_lea.vmem %s558_s7, 1024  ;;  %p890_p11 = scmp.lt.s32.totalorder %s558_s7, %s558_s7 }
  0x42   :  { %759 = vmatpush3.bf16.msra.mxu1 %v800_v5  ;;  %728 = vmatprep.subr.bf16.mxu0 %v801_v6  ;;  %p886_p10 = scmp.ne.s32.totalorder %s558_s7, %s885_s10  ;;  %p891_p12 = scmp.lt.s32.totalorder %s885_s10, %s885_s10 }
  0x43   :  { %760 = vmatprep.subr.bf16.mxu1 %v802_v7 }
  0x44   :  { %p892_p13 = por %p891_p12, %p890_p11 }
  0x45   :  { %729 = vmatpush3.bf16.msra.mxu0 %v801_v6 }
  0x46   :  { %761 = vmatpush3.bf16.msra.mxu1 %v802_v7  ;;  %730 = vmatprep.subr.bf16.mxu0 %v803_v8  ;;  %p893_p0 = pnand %p892_p13, %p886_p10 }
  0x47   :  { %762 = vmatprep.subr.bf16.mxu1 %v804_v9 }
  0x49   :  { %731 = vmatpush3.bf16.msra.mxu0 %v803_v8 }
  0x4a   :  { %763 = vmatpush3.bf16.msra.mxu1 %v804_v9  ;;  %732 = vmatprep.subr.bf16.mxu0 %v805_v10 }
  0x4b   :  { %764 = vmatprep.subr.bf16.mxu1 %v806_v12 }
  0x4d   :  { %733 = vmatpush3.bf16.msra.mxu0 %v805_v10 }
  0x4e   :  { %765 = vmatpush3.bf16.msra.mxu1 %v806_v12  ;;  %734 = vmatprep.subr.bf16.mxu0 %v807_v13 }
  0x4f   :  { %766 = vmatprep.subr.bf16.mxu1 %v808_v14 }
  0x51   :  { %735 = vmatpush3.bf16.msra.mxu0 %v807_v13 }
  0x52   :  { %767 = vmatpush3.bf16.msra.mxu1 %v808_v14  ;;  %736 = vmatprep.subr.bf16.mxu0 %v809_v15 }
  0x53   :  { %768 = vmatprep.subr.bf16.mxu1 %v810_v16 }
  0x55   :  { %737 = vmatpush3.bf16.msra.mxu0 %v809_v15 }
  0x56   :  { %769 = vmatpush3.bf16.msra.mxu1 %v810_v16 }
  0x58   :  { %739 = vmatmul.mubr.bf16.vlgmr.msra.gmra.mrb[0].mxu0 %v812_v17 }
  0x59   :  { %771 = vmatmul.mubr.bf16.vlgmr.msra.gmra.mrb[0].mxu1 %v812_v17  ;;  %742 = vmatprep.mubr.bf16.mxu0 %v813_v18 }
  0x5a   :  { %774 = vmatprep.mubr.bf16.mxu1 %v813_v18 }
  0x60   :  { %743 = vmatmul.mubr.bf16.gmra.mrb[4].mxu0 %v814_v19 }
  0x61   :  { %775 = vmatmul.mubr.bf16.gmra.mrb[4].mxu1 %v814_v19  ;;  %746 = vmatprep.mubr.bf16.mxu0 %v815_v20 }
  0x62   :  { %778 = vmatprep.mubr.bf16.mxu1 %v815_v20 }
  0x68   :  { %747 = vmatmul.mubr.bf16.gmra.mrb[8].mxu0 %v816_v21 }
  0x69   :  { %779 = vmatmul.mubr.bf16.gmra.mrb[8].mxu1 %v816_v21  ;;  %750 = vmatprep.mubr.bf16.mxu0 %v817_v22 }
  0x6a   :  { %782 = vmatprep.mubr.bf16.mxu1 %v817_v22 }
  0x70   :  { %751 = vmatmul.mubr.bf16.gmra.mrb[12].mxu0 %v818_v23 }
  0x71   :  { %783 = vmatmul.mubr.bf16.gmra.mrb[12].mxu1 %v818_v23 }
 0x12b   :  { %v740_v25 = vpop.f32.mrb[0].mxu0 }
 0x12c   :  { %v772_v26 = vpop.f32.mrb[0].mxu1  ;;  %v225_v27 = vpop.f32.mrb[1].mxu0 }
 0x12d   :  { %v482_v28 = vadd.f32 %v772_v26, %v1031_v24  ;;  %v473_v29 = vpop.f32.mrb[1].mxu1  ;;  %v741_v30 = vpop.f32.mrb[2].mxu0 }
 0x12e   :  { %v474_v31 = vadd.f32 %v1031_v24, %v473_v29  ;;  %v651_v32 = vpack.c.bf16 %v741_v30, %v740_v25  ;;  %v773_v33 = vpop.f32.mrb[2].mxu1  ;;  %v228_v34 = vpop.f32.mrb[3].mxu0 }
 0x12f   :  { %538 = vst [vmem:[#allocation9 + $0x10] sm:$0xff] %v482_v28  ;;  %v485_v35 = vadd.f32 %v773_v33, %v1031_v24  ;;  %v646_v36 = vpack.c.bf16 %v228_v34, %v225_v27  ;;  %v476_v37 = vpop.f32.mrb[3].mxu1 }
 0x130   :  { %536 = vst [vmem:[#allocation9] sm:$0xff] %v474_v31  ;;  %683 = vst [vmem:[#allocation8 + $0x8] sm:$0xff] %v651_v32   ;;  %v477_v38 = vadd.f32 %v1031_v24, %v476_v37 }
 0x131   :  { %539 = vst [vmem:[#allocation9 + $0x18] sm:$0xff] %v485_v35  ;;  %647 = vst [vmem:[#allocation8] sm:$0xff] %v646_v36  }
 0x132   :  { %537 = vst [vmem:[#allocation9 + $0x8] sm:$0xff] %v477_v38 }
 0x133   :  { %v744_v39 = vpop.f32.mrb[4].mxu0 }
 0x134   :  { %v776_v40 = vpop.f32.mrb[4].mxu1  ;;  %v241_v41 = vpop.f32.mrb[5].mxu0 }
 0x135   :  { %v498_v42 = vadd.f32 %v776_v40, %v1031_v24  ;;  %v489_v43 = vpop.f32.mrb[5].mxu1  ;;  %v745_v44 = vpop.f32.mrb[6].mxu0 }
 0x136   :  { %v490_v45 = vadd.f32 %v1031_v24, %v489_v43  ;;  %v661_v46 = vpack.c.bf16 %v745_v44, %v744_v39  ;;  %v777_v47 = vpop.f32.mrb[6].mxu1  ;;  %v244_v48 = vpop.f32.mrb[7].mxu0 }
 0x137   :  { %542 = vst [vmem:[#allocation9 + $0x30] sm:$0xff] %v498_v42  ;;  %v501_v49 = vadd.f32 %v777_v47, %v1031_v24  ;;  %v656_v50 = vpack.c.bf16 %v244_v48, %v241_v41  ;;  %v492_v51 = vpop.f32.mrb[7].mxu1 }
 0x138   :  { %540 = vst [vmem:[#allocation9 + $0x20] sm:$0xff] %v490_v45  ;;  %685 = vst [vmem:[#allocation8 + $0x18] sm:$0xff] %v661_v46   ;;  %v493_v52 = vadd.f32 %v1031_v24, %v492_v51 }
 0x139   :  { %543 = vst [vmem:[#allocation9 + $0x38] sm:$0xff] %v501_v49  ;;  %684 = vst [vmem:[#allocation8 + $0x10] sm:$0xff] %v656_v50  }
 0x13a   :  { %541 = vst [vmem:[#allocation9 + $0x28] sm:$0xff] %v493_v52 }
 0x13b   :  { %v748_v53 = vpop.f32.mrb[8].mxu0 }
 0x13c   :  { %v780_v54 = vpop.f32.mrb[8].mxu1  ;;  %v257_v55 = vpop.f32.mrb[9].mxu0 }
 0x13d   :  { %v514_v56 = vadd.f32 %v780_v54, %v1031_v24  ;;  %v505_v57 = vpop.f32.mrb[9].mxu1  ;;  %v749_v58 = vpop.f32.mrb[10].mxu0 }
 0x13e   :  { %v506_v59 = vadd.f32 %v1031_v24, %v505_v57  ;;  %v671_v60 = vpack.c.bf16 %v749_v58, %v748_v53  ;;  %v781_v61 = vpop.f32.mrb[10].mxu1  ;;  %v260_v62 = vpop.f32.mrb[11].mxu0 }
 0x13f   :  { %546 = vst [vmem:[#allocation9 + $0x50] sm:$0xff] %v514_v56  ;;  %v517_v63 = vadd.f32 %v781_v61, %v1031_v24  ;;  %v666_v0 = vpack.c.bf16 %v260_v62, %v257_v55  ;;  %v508_v1 = vpop.f32.mrb[11].mxu1 }
 0x140   :  { %544 = vst [vmem:[#allocation9 + $0x40] sm:$0xff] %v506_v59  ;;  %687 = vst [vmem:[#allocation8 + $0x28] sm:$0xff] %v671_v60   ;;  %v509_v2 = vadd.f32 %v1031_v24, %v508_v1 }
 0x141   :  { %547 = vst [vmem:[#allocation9 + $0x58] sm:$0xff] %v517_v63  ;;  %686 = vst [vmem:[#allocation8 + $0x20] sm:$0xff] %v666_v0  }
 0x142   :  { %545 = vst [vmem:[#allocation9 + $0x48] sm:$0xff] %v509_v2 }
 0x143   :  { %v752_v3 = vpop.f32.mrb[12].mxu0 }
 0x144   :  { %v784_v4 = vpop.f32.mrb[12].mxu1  ;;  %v273_v5 = vpop.f32.mrb[13].mxu0 }
 0x145   :  { %v530_v6 = vadd.f32 %v784_v4, %v1031_v24  ;;  %v521_v7 = vpop.f32.mrb[13].mxu1  ;;  %v753_v8 = vpop.f32.mrb[14].mxu0 }
 0x146   :  { %v522_v9 = vadd.f32 %v1031_v24, %v521_v7  ;;  %v681_v10 = vpack.c.bf16 %v753_v8, %v752_v3  ;;  %v785_v11 = vpop.f32.mrb[14].mxu1  ;;  %v276_v12 = vpop.f32.mrb[15].mxu0 }
 0x147   :  { %550 = vst [vmem:[#allocation9 + $0x70] sm:$0xff] %v530_v6  ;;  %v533_v13 = vadd.f32 %v785_v11, %v1031_v24  ;;  %v676_v14 = vpack.c.bf16 %v276_v12, %v273_v5  ;;  %v524_v15 = vpop.f32.mrb[15].mxu1 }
 0x148   :  { %548 = vst [vmem:[#allocation9 + $0x60] sm:$0xff] %v522_v9  ;;  %689 = vst [vmem:[#allocation8 + $0x38] sm:$0xff] %v681_v10   ;;  %v525_v16 = vadd.f32 %v1031_v24, %v524_v15 }
 0x149   :  { %551 = vst [vmem:[#allocation9 + $0x78] sm:$0xff] %v533_v13  ;;  %688 = vst [vmem:[#allocation8 + $0x30] sm:$0xff] %v676_v14  }
 0x14a   :  { %549 = vst [vmem:[#allocation9 + $0x68] sm:$0xff] %v525_v16 }
 0x14b   :  { %896 = shalt.err (!%p893_p0)
}
 0x14c   :  { %s897_s13 = scalar_lea.hbm %s1087_s4, 1024 }
 0x14d   :  { %p898_p1 = scmp.ne.s32.totalorder %s1087_s4, %s897_s13  ;;  %p901_p2 = scmp.lt.u32.totalorder %s897_s13, %s1087_s4 }
 0x14f   :  { %p903_p3 = pnand %p901_p2, %p898_p1 }
 0x151   :  { %906 = shalt.err (!%p903_p3)
}
 0x152   :  { %563 = dma.vmem_to_hbm [thread:$0]  %s558_s7, 1024, %s1087_s4, [#allocation4], %s939_s30, %s939_s30, %s940_s6  }
 0x153   :  { %s907_s19 = scalar_lea.vmem %s1048_s9, 2048  ;;  %p912_p5 = scmp.lt.s32.totalorder %s1048_s9, %s1048_s9 }
 0x154   :  { %p908_p4 = scmp.ne.s32.totalorder %s1048_s9, %s907_s19  ;;  %p913_p6 = scmp.lt.s32.totalorder %s907_s19, %s907_s19 }
 0x156   :  { %p914_p7 = por %p913_p6, %p912_p5 }
 0x158   :  { %p915_p8 = pnand %p914_p7, %p908_p4 }
 0x15a   :  { %918 = shalt.err (!%p915_p8)
}
 0x15b   :  { %s919_s23 = scalar_lea.hbm %s1088_s5, 2048 }
 0x15c   :  { %p920_p9 = scmp.ne.s32.totalorder %s1088_s5, %s919_s23  ;;  %p923_p10 = scmp.lt.u32.totalorder %s919_s23, %s1088_s5 }
 0x15e   :  { %p925_p11 = pnand %p923_p10, %p920_p9 }
 0x160   :  { %928 = shalt.err (!%p925_p11)
}
 0x161   :  { %s944_s4 = smov 128   ;;  %s945_s30 = smov 8  }
 0x162   :  { %575 = dma.vmem_to_hbm [thread:$0]  %s1048_s9, 2048, %s1088_s5, [#allocation10], %s944_s4, %s944_s4, %s945_s30  }
 0x163   :  { %933 = dma.done.wait [#allocation4], 1024  }
 0x164   :  { %934 = vsyncadd [#allocation4], 4294966272 }
 0x165   :  { %935 = dma.done.wait [#allocation10], 2048  }
 0x166   :  { %936 = vsyncadd [#allocation10], 4294965248 }
 0x167   :  { %582 = vsyncpa [#allocation3], 1 }
 0x168   :  { %583 = vsyncpa [#allocation6], 1 }
 0x169   :  { %584 = vsyncpa [#allocation4], 1 }
 0x16a   :  { %585 = vsyncpa [#allocation10], 1 }

</bundles_post_ra>
